<compile_context>
chip_gen: v5e
topology: v5e:2x2
jax: 0.10.0
libtpu: 0.0.40
codegen_flags: <defaults>
</compile_context>

<pallas_src>
import jax
import jax.numpy as jnp
from jax import lax
from jax.experimental import pallas as pl
from jax.experimental.pallas import tpu as pltpu

LANES = 128
SUBLANES = 8
CHUNK_ROWS = 512          # rows folded per inner-loop step (keeps diff temp small)


def _round_up(x, m):
    return ((x + m - 1) // m) * m


def _tpu_plan(itemsize):
    """Per-generation plan: (max_rows_per_tile, num_core_splits, sublane_align)."""
    sub_align = {4: 8, 2: 16, 1: 32}.get(itemsize, 8)
    kind = ""
    try:
        kind = jax.devices()[0].device_kind.lower()
    except Exception:  # defensive: fall through to conservative defaults
        pass
    if "7" in kind:            # v7x: 2 TCs/chip, 64 MiB VMEM, ~3.2 TB/s HBM
        return 8192, 2, sub_align
    if "v6" in kind:           # v6e: single TC, 128 MiB VMEM
        return 4096, 1, sub_align
    return 2048, 1, sub_align  # v5e / unknown: conservative


def _make_l1_partial_kernel(rows_valid, rows_per_tile, chunk, tiles_per_core,
                            needs_mask):
    num_chunks = rows_per_tile // chunk
    unroll = num_chunks <= 8

    def fold(sr_ref, hr_ref, start_row, masked):
        def body(i, acc):
            r0 = pl.multiple_of(i * chunk, chunk)
            s = sr_ref[pl.ds(r0, chunk), :].astype(jnp.float32)
            h = hr_ref[pl.ds(r0, chunk), :].astype(jnp.float32)
            d = jnp.abs(s - h)
            if masked:
                row_ids = start_row + r0 + lax.broadcasted_iota(
                    jnp.int32, (chunk, LANES), 0)
                d = jnp.where(row_ids < rows_valid, d, 0.0)
            # Fold only the leading sublane-block axis: pure vreg-wise VPU adds.
            return acc + d.reshape(chunk // SUBLANES, SUBLANES, LANES).sum(axis=0)

        return lax.fori_loop(0, num_chunks, body,
                             jnp.zeros((SUBLANES, LANES), jnp.float32),
                             unroll=unroll)

    def kernel(sr_ref, hr_ref, out_ref):
        c = pl.program_id(0)
        j = pl.program_id(1)

        # Output block index is constant across j: the (8,128) slab stays
        # resident in VMEM and acts as the per-core accumulator.
        @pl.when(j == 0)
        def _():
            out_ref[...] = jnp.zeros_like(out_ref)

        start_row = (c * tiles_per_core + j) * rows_per_tile

        if not needs_mask:
            out_ref[...] += fold(sr_ref, hr_ref, start_row, masked=False)
        else:
            # Steady-state fast path: fully in-range tile, no masking.
            @pl.when(start_row + rows_per_tile <= rows_valid)
            def _():
                out_ref[...] += fold(sr_ref, hr_ref, start_row, masked=False)

            # Single straddling boundary tile: per-row mask. Fully out-of-range
            # (clamped) tiles take neither branch and contribute nothing.
            @pl.when(jnp.logical_and(start_row < rows_valid,
                                     start_row + rows_per_tile > rows_valid))
            def _():
                out_ref[...] += fold(sr_ref, hr_ref, start_row, masked=True)

    return kernel


def l1_loss_pallas(sr, hr):
    """mean(|sr - hr|) over all elements, matching torch.nn.L1Loss()."""
    assert sr.shape == hr.shape, "SR/HR must have identical shapes"
    n_elems = sr.size
    assert n_elems > 0, "L1 loss of empty tensors is undefined"

    sr_flat = sr.reshape(-1)
    hr_flat = hr.reshape(-1)
    itemsize = jnp.dtype(sr.dtype).itemsize
    max_rows_per_tile, num_splits, sub_align = _tpu_plan(itemsize)

    # Ragged (<128 element) tail handled in plain JAX; the main body uses a free
    # flat -> (rows, 128) reshape on the first floor(n/128)*128 elements.
    n_main = (n_elems // LANES) * LANES
    tail_sum = jnp.float32(0.0)
    if n_main < n_elems:
        tail_sum = jnp.sum(jnp.abs(sr_flat[n_main:].astype(jnp.float32)
                                   - hr_flat[n_main:].astype(jnp.float32)))

    if n_main == 0:
        total = tail_sum
    else:
        rows = n_main // LANES
        sr2d = sr_flat[:n_main].reshape(rows, LANES)
        hr2d = hr_flat[:n_main].reshape(rows, LANES)

        chunk = min(CHUNK_ROWS, _round_up(rows, sub_align))
        if rows <= chunk:
            rows_per_tile = _round_up(rows, sub_align)
            chunk = rows_per_tile
        else:
            rows_per_tile = min(max_rows_per_tile, _round_up(rows, chunk))

        total_tiles = pl.cdiv(rows, rows_per_tile)
        tiles_per_core = pl.cdiv(total_tiles, num_splits)
        covered_rows = num_splits * tiles_per_core * rows_per_tile
        needs_mask = covered_rows != rows

        def in_index_map(c, j):
            t = c * tiles_per_core + j
            # Clamp grid points past the last real tile onto a valid tile; their
            # contribution is skipped inside the kernel.
            return (jnp.minimum(t, total_tiles - 1), 0)

        kernel = _make_l1_partial_kernel(rows, rows_per_tile, chunk,
                                         tiles_per_core, needs_mask)

        cost = pl.CostEstimate(
            flops=3 * n_main,
            transcendentals=0,
            bytes_accessed=2 * n_main * itemsize
            + num_splits * SUBLANES * LANES * 4,
        )

        partials = pl.pallas_call(
            kernel,
            out_shape=jax.ShapeDtypeStruct(
                (num_splits * SUBLANES, LANES), jnp.float32),
            grid_spec=pltpu.PrefetchScalarGridSpec(
                num_scalar_prefetch=0,
                grid=(num_splits, tiles_per_core),
                in_specs=[
                    pl.BlockSpec((rows_per_tile, LANES), in_index_map),
                    pl.BlockSpec((rows_per_tile, LANES), in_index_map),
                ],
                out_specs=pl.BlockSpec((SUBLANES, LANES), lambda c, j: (c, 0)),
            ),
            compiler_params=pltpu.CompilerParams(
                # TODO(synk): on v7x verify the leading "parallel" axis really
                # shards across both TensorCores (else move to CORE_PARALLEL /
                # pl.core_map over a tensorcore mesh).
                dimension_semantics=("parallel", "arbitrary"),
                vmem_limit_bytes=32 * 1024 * 1024,
            ),
            cost_estimate=cost,
        )(sr2d, hr2d)

        total = jnp.sum(partials) + tail_sum

    return (total / jnp.float32(n_elems)).astype(jnp.float32)


if __name__ == "__main__":
    key = jax.random.PRNGKey(0)
    k1, k2 = jax.random.split(key)

    # Small shapes consistent with an SR model output: NCHW = [2, 4, 16, 16]
    SR = jax.random.normal(k1, (2, 4, 16, 16), dtype=jnp.float32)
    HR = jax.random.normal(k2, (2, 4, 16, 16), dtype=jnp.float32)

    loss = l1_loss_pallas(SR, HR)
    jax.block_until_ready(loss)

    # Pure-JAX reference check (mean absolute error).
    ref = jnp.mean(jnp.abs(SR - HR))
    assert jnp.allclose(loss, ref, rtol=1e-5, atol=1e-5), (loss, ref)

    print("KERNEL_OK")
</pallas_src>

<mosaic_0001>
module attributes {stable_mosaic.version = 11 : i64} {
  func.func @kernel(%arg0: i32, %arg1: i32, %arg2: memref<16x128xf32, #tpu.memory_space<vmem>>, %arg3: memref<16x128xf32, #tpu.memory_space<vmem>>, %arg4: memref<8x128xf32, #tpu.memory_space<vmem>>) attributes {dimension_semantics = [#tpu.dimension_semantics<parallel>, #tpu.dimension_semantics<arbitrary>], iteration_bounds = array<i64: 1, 1>, scalar_prefetch = 0 : i64, scratch_operands = 0 : i64, tpu.core_type = #tpu.core_type<tc>, window_params = [{transform_indices = @transform_0, window_bounds = array<i64: 16, 128>}, {transform_indices = @transform_1, window_bounds = array<i64: 16, 128>}, {transform_indices = @transform_2, window_bounds = array<i64: 8, 128>}]} {
    %c0_i32 = arith.constant 0 : i32
    %0 = arith.cmpi eq, %arg1, %c0_i32 : i32
    %1 = arith.extui %0 : i1 to i32
    %c0_i32_0 = arith.constant 0 : i32
    %2 = arith.cmpi ne, %1, %c0_i32_0 : i32
    scf.if %2 {
      %cst_8 = arith.constant 0.000000e+00 : f32
      %18 = vector.broadcast %cst_8 : f32 to vector<8x128xf32>
      %c0_9 = arith.constant 0 : index
      %c0_10 = arith.constant 0 : index
      %19 = vector.load %arg4[%c0_9, %c0_10] : memref<8x128xf32, #tpu.memory_space<vmem>>, vector<8x128xf32>
      tpu.vector_store %arg4[%c0_9, %c0_10], %18 {strides = array<i32>} : memref<8x128xf32, #tpu.memory_space<vmem>>, vector<8x128xf32>,
    } else {
    }
    %c0 = arith.constant 0 : index
    %c0_1 = arith.constant 0 : index
    %3 = vector.load %arg4[%c0, %c0_1] : memref<8x128xf32, #tpu.memory_space<vmem>>, vector<8x128xf32>
    %cst = arith.constant 0.000000e+00 : f32
    %4 = vector.broadcast %cst : f32 to vector<8x128xf32>
    %c0_i32_2 = arith.constant 0 : i32
    %c16_i32 = arith.constant 16 : i32
    %5 = arith.muli %c0_i32_2, %c16_i32 : i32
    %6 = tpu.assume_multiple %5, 16 : i32
    %7 = arith.index_cast %6 : i32 to index
    %c0_3 = arith.constant 0 : index
    %8 = vector.load %arg2[%7, %c0_3] : memref<16x128xf32, #tpu.memory_space<vmem>>, vector<16x128xf32>
    %9 = arith.index_cast %6 : i32 to index
    %c0_4 = arith.constant 0 : index
    %10 = vector.load %arg3[%9, %c0_4] : memref<16x128xf32, #tpu.memory_space<vmem>>, vector<16x128xf32>
    %11 = arith.subf %8, %10 : vector<16x128xf32>
    %12 = math.absf %11 : vector<16x128xf32>
    %13 = vector.shape_cast %12 : vector<16x128xf32> to vector<2x8x128xf32>
    %cst_5 = arith.constant dense<0.000000e+00> : vector<8x128xf32>
    %14 = vector.multi_reduction <add>, %13, %cst_5 [0] : vector<2x8x128xf32> to vector<8x128xf32>
    %15 = arith.addf %4, %14 : vector<8x128xf32>
    %c1_i32 = arith.constant 1 : i32
    %16 = arith.addf %3, %15 : vector<8x128xf32>
    %c0_6 = arith.constant 0 : index
    %c0_7 = arith.constant 0 : index
    %17 = vector.load %arg4[%c0_6, %c0_7] : memref<8x128xf32, #tpu.memory_space<vmem>>, vector<8x128xf32>
    tpu.vector_store %arg4[%c0_6, %c0_7], %16 {strides = array<i32>} : memref<8x128xf32, #tpu.memory_space<vmem>>, vector<8x128xf32>,
    return
  }
  func.func @transform_0(%arg0: i32, %arg1: i32) -> (i32, i32) {
    %c1_i32 = arith.constant 1 : i32
    %0 = arith.muli %arg0, %c1_i32 : i32
    %1 = arith.addi %0, %arg1 : i32
    %c0_i32 = arith.constant 0 : i32
    %2 = arith.minsi %1, %c0_i32 : i32
    %c0_i32_0 = arith.constant 0 : i32
    %c0_i32_1 = arith.constant 0 : i32
    return %2, %c0_i32_0 : i32, i32
  }
  func.func @transform_1(%arg0: i32, %arg1: i32) -> (i32, i32) {
    %c1_i32 = arith.constant 1 : i32
    %0 = arith.muli %arg0, %c1_i32 : i32
    %1 = arith.addi %0, %arg1 : i32
    %c0_i32 = arith.constant 0 : i32
    %2 = arith.minsi %1, %c0_i32 : i32
    %c0_i32_0 = arith.constant 0 : i32
    %c0_i32_1 = arith.constant 0 : i32
    return %2, %c0_i32_0 : i32, i32
  }
  func.func @transform_2(%arg0: i32, %arg1: i32) -> (i32, i32) {
    %c0_i32 = arith.constant 0 : i32
    %c0_i32_0 = arith.constant 0 : i32
    return %arg0, %c0_i32 : i32, i32
  }
}

</mosaic_0001>

<bundles_post_ra>
// kernel: tpu_custom_call.1
= control target key start
LH: loop header
LB: loop body
LE: loop exit
PB: predicated region body
PF: predicated region fallthrough
CT: control target
= control target key end

     0   :  { %7 = vsyncpa [#allocation3], 0  ;;  %s217_s0 = inlined_call_operand.hbm [shape: f32[16,128], index: 0, kind: input, shape index: {}]   ;;  %s218_s1 = inlined_call_operand.hbm [shape: f32[16,128], index: 1, kind: input, shape index: {}]   ;;  %s219_s2 = inlined_call_operand.hbm [shape: f32[8,128], index: 2, kind: output, shape index: {}]  }
   0x1   :  { %8 = vsyncpa [#allocation6], 0 }
   0x2   :  { %9 = vsyncpa [#allocation4], 0  ;;  %s20_s11 = sshll.u32 %s217_s0, 4  ;;  %s188_s12 = smov [#allocation2]   ;;  %s21_s11 = int_to_ptr.hbm [resolvable:$true] %s20_s11 }
   0x3   :  { %s22_s13 = sshll.u32 %s188_s12, 4  ;;  %s39_s16 = sshll.u32 %s218_s1, 4  ;;  %s23_s13 = int_to_ptr.vmem [resolvable:$true] %s22_s13  ;;  %s40_s16 = int_to_ptr.hbm [resolvable:$true] %s39_s16 }
   0x4   :  { %s189_s17 = smov 128   ;;  %s190_s18 = smov 8  }
   0x5   :  { %28 = dma.hbm_to_vmem [thread:$0]  %s21_s11, 256, %s23_s13, [#allocation3], %s189_s17, %s189_s17, %s190_s18  }
   0x6   :  { %s191_s19 = smov [#allocation5]  }
   0x7   :  { %s41_s20 = sshll.u32 %s191_s19, 4  ;;  %s42_s20 = int_to_ptr.vmem [resolvable:$true] %s41_s20 }
   0x8   :  { %47 = dma.hbm_to_vmem [thread:$0]  %s40_s16, 256, %s42_s20, [#allocation6], %s189_s17, %s189_s17, %s190_s18  }
   0x9   :  { %182 = dma.done.wait [#allocation3], 256  }
   0xa   :  { %183 = vsyncadd [#allocation3], 4294967040 }
   0xb   :  { %184 = dma.done.wait [#allocation6], 256  }
   0xc   :  { %185 = vsyncadd [#allocation6], 4294967040  ;;  %v70_v0 = vld [vmem:[#allocation2] sm:$0xff]  ;;  %v71_v1 = vld [vmem:[#allocation2 + $0x8] sm:$0xff]  ;;  %s192_s0 = smov [#allocation7]   ;;  %s89_s23 = sshll.u32 %s219_s2, 4  ;;  %s90_s23 = int_to_ptr.hbm [resolvable:$true] %s89_s23 }
   0xd   :  { %v72_v2 = vld [vmem:[#allocation5] sm:$0xff]  ;;  %v73_v3 = vld [vmem:[#allocation5 + $0x8] sm:$0xff]  ;;  %s87_s1 = sshll.u32 %s192_s0, 4  ;;  %s88_s1 = int_to_ptr.vmem [resolvable:$true] %s87_s1 }
   0xe   :  { %v74_v4 = vsub.f32 %v70_v0, %v72_v2  ;;  %v75_v5 = vsub.f32 %v71_v1, %v73_v3 }
  0x10   :  { %v76_v6 = vand.u32 2147483647, %v74_v4  ;;  %v77_v7 = vand.u32 2147483647, %v75_v5 }
  0x12   :  { %v78_v8 = vadd.f32 %v77_v7, %v76_v6 }
  0x14   :  { %81 = vst [vmem:[#allocation7] sm:$0xff] %v78_v8 }
  0x15   :  { %92 = dma.vmem_to_hbm [thread:$0]  %s88_s1, 128, %s90_s23, [#allocation4]  }
  0x16   :  { %186 = dma.done.wait [#allocation4], 128  }
  0x17   :  { %187 = vsyncadd [#allocation4], 4294967168 }
  0x18   :  { %97 = vsyncpa [#allocation3], 1 }
  0x19   :  { %98 = vsyncpa [#allocation6], 1 }
  0x1a   :  { %99 = vsyncpa [#allocation4], 1 }

</bundles_post_ra>
